<compile_context>
chip_gen: v7x
topology: tpu7x:2x2x1
jax: 0.10.0
libtpu: 0.0.40
codegen_flags: <defaults>
</compile_context>

<pallas_src>
import functools
import math

import jax
import jax.numpy as jnp
from jax.experimental import pallas as pl
from jax.experimental.pallas import tpu as pltpu


def _attention_kernel(x_ref, wqkv_ref, bqkv_ref, wo_ref, bo_ref, *out_refs,
                      scale, compute_dtype, approx_recip):
    # x_ref block: (B, M, K); wqkv: (K, 3K) compute_dtype; bqkv: (1, 3K) f32;
    # wo: (K, K) compute_dtype; bo: (1, K) f32.
    y_ref = out_refs[0]
    aw_ref = out_refs[1] if len(out_refs) > 1 else None   # absent when weights unused

    B, M, K = x_ref.shape
    x2 = x_ref[...].reshape(B * M, K).astype(compute_dtype)   # one slab for projections

    # Fused QKV projection: a single MXU matmul covering all three projections.
    qkv = jnp.dot(x2, wqkv_ref[...].astype(compute_dtype),
                  preferred_element_type=jnp.float32) + bqkv_ref[...]   # (B*M, 3K) f32

    q = qkv[:, 0:K].reshape(B, M, K) * scale       # fold 1/sqrt(K) into q (B*M*K elems)
    k = qkv[:, K:2 * K].reshape(B, M, K)
    v = qkv[:, 2 * K:3 * K].reshape(B, M, K)

    # Batched QK^T: contraction over the last dim of both operands -> dot_general
    # with a batch dim, no explicit k.T materialization.
    scores = jnp.einsum("bmk,bnk->bmn",
                        q.astype(compute_dtype), k.astype(compute_dtype),
                        preferred_element_type=jnp.float32)             # (B, M, M) f32

    # Numerically-stable softmax over the last axis (f32 math, EUP exp).
    m = jnp.max(scores, axis=-1, keepdims=True)
    e = jnp.exp(scores - m)
    denom = jnp.sum(e, axis=-1, keepdims=True)
    attn = e * pl.reciprocal(denom, approx=approx_recip)                # (B, M, M) f32

    ctx = jnp.einsum("bmn,bnk->bmk",
                     attn.astype(compute_dtype), v.astype(compute_dtype),
                     preferred_element_type=jnp.float32)                # (B, M, K) f32

    out = jnp.dot(ctx.reshape(B * M, K).astype(compute_dtype),
                  wo_ref[...].astype(compute_dtype),
                  preferred_element_type=jnp.float32) + bo_ref[...]

    y_ref[...] = out.reshape(B, M, K).astype(y_ref.dtype)
    if aw_ref is not None:
        aw_ref[...] = attn.astype(aw_ref.dtype)


def _choose_block_s(S, max_block_s=8):
    """Largest divisor of S that is <= max_block_s while keeping >= 2 grid steps
    when S >= 2 (so v7x's two TensorCores both get work)."""
    best = 1
    for b in range(1, min(S, max_block_s) + 1):
        if S % b == 0 and (S == 1 or S // b >= 2):
            best = b
    return best


def attention_forward(x, params, return_weights=True, *, block_s=None,
                      compute_dtype=jnp.float32, approx_recip=False):
    """x: (S, M, K) float32. Returns (y:(S, M, K), attn_weights:(S, M, M) or None)."""
    S, M, K = x.shape
    wq, bq, wk, bk, wv, bv, wo, bo = params
    scale = 1.0 / math.sqrt(K)

    if block_s is None:
        block_s = _choose_block_s(S)
    assert S % block_s == 0, "block_s must divide S"
    grid = (S // block_s,)

    # Fuse the three projection matrices / biases; store matrices in the MXU compute
    # dtype (halves weight DMA/VMEM when bf16). Biases stay f32 for the VPU adds.
    wqkv = jnp.concatenate([wq, wk, wv], axis=1).astype(compute_dtype)   # (K, 3K)
    bqkv = jnp.concatenate([bq, bk, bv], axis=1).astype(jnp.float32)     # (1, 3K)
    wo_c = wo.astype(compute_dtype)
    bo_c = bo.astype(jnp.float32)

    kernel = functools.partial(_attention_kernel, scale=scale,
                               compute_dtype=compute_dtype,
                               approx_recip=approx_recip)

    x_spec = pl.BlockSpec((block_s, M, K), lambda s: (s, 0, 0))
    wqkv_spec = pl.BlockSpec((K, 3 * K), lambda s: (0, 0))   # constant block
    bqkv_spec = pl.BlockSpec((1, 3 * K), lambda s: (0, 0))
    wo_spec = pl.BlockSpec((K, K), lambda s: (0, 0))
    bo_spec = pl.BlockSpec((1, K), lambda s: (0, 0))
    y_spec = pl.BlockSpec((block_s, M, K), lambda s: (s, 0, 0))

    if return_weights:
        out_shape = (jax.ShapeDtypeStruct((S, M, K), x.dtype),
                     jax.ShapeDtypeStruct((S, M, M), jnp.float32))
        out_specs = (y_spec, pl.BlockSpec((block_s, M, M), lambda s: (s, 0, 0)))
    else:
        # No (S, M, M) output at all: no HBM writeback, no double-buffered aw block.
        out_shape = jax.ShapeDtypeStruct((S, M, K), x.dtype)
        out_specs = y_spec

    result = pl.pallas_call(
        kernel,
        out_shape=out_shape,
        grid_spec=pltpu.PrefetchScalarGridSpec(
            num_scalar_prefetch=0,
            grid=grid,
            in_specs=[x_spec, wqkv_spec, bqkv_spec, wo_spec, bo_spec],
            out_specs=out_specs,
        ),
        compiler_params=pltpu.CompilerParams(
            dimension_semantics=("parallel",),
            vmem_limit_bytes=32 * 1024 * 1024,
        ),
    )(x, wqkv, bqkv, wo_c, bo_c)

    if return_weights:
        y, aw = result
        return y, aw
    return result, None


def init_params(key, d_model):
    """Deterministic init for the four linear layers (Wq, Wk, Wv, Wout)."""
    keys = jax.random.split(key, 8)
    bound = 1.0 / math.sqrt(d_model)

    def lin(kw, kb):
        w = jax.random.uniform(kw, (d_model, d_model), jnp.float32, -bound, bound)
        b = jax.random.uniform(kb, (1, d_model), jnp.float32, -bound, bound)
        return w, b

    wq, bq = lin(keys[0], keys[1])
    wk, bk = lin(keys[2], keys[3])
    wv, bv = lin(keys[4], keys[5])
    wo, bo = lin(keys[6], keys[7])
    return (wq, bq, wk, bk, wv, bv, wo, bo)


def _reference(x, params):
    wq, bq, wk, bk, wv, bv, wo, bo = params
    q = x @ wq + bq
    k = x @ wk + bk
    v = x @ wv + bv
    scores = jnp.einsum("smk,snk->smn", q, k) / math.sqrt(x.shape[-1])
    attn = jax.nn.softmax(scores, axis=-1)
    y = jnp.einsum("smn,snk->smk", attn, v) @ wo + bo
    return y, attn


if __name__ == "__main__":
    S, M, K = 4, 8, 32   # S sequences, M time points, d_model = K
    key = jax.random.PRNGKey(0)
    kx, kp = jax.random.split(key)
    x = jax.random.normal(kx, (S, M, K), dtype=jnp.float32)
    params = init_params(kp, K)

    y_ref, aw_ref = _reference(x, params)

    # 1) Precise (f32) path, returning attention weights. block_s chosen so that
    #    two sequences are processed per grid step and the grid still has 2 steps.
    y, attn_weights = attention_forward(x, params, return_weights=True)
    jax.block_until_ready((y, attn_weights))
    assert y.shape == (S, M, K) and attn_weights.shape == (S, M, M)
    assert jnp.allclose(y, y_ref, atol=1e-4, rtol=1e-4)
    assert jnp.allclose(attn_weights, aw_ref, atol=1e-5, rtol=1e-5)

    # 2) return_weights=False: the (S, M, M) tensor is never written to HBM.
    y2, no_w = attention_forward(x, params, return_weights=False)
    jax.block_until_ready(y2)
    assert no_w is None
    assert jnp.allclose(y2, y_ref, atol=1e-4, rtol=1e-4)

    # 3) Fast path: bf16 MXU operands (f32 accumulation) + approx reciprocal.
    y3, aw3 = attention_forward(x, params, return_weights=True,
                                compute_dtype=jnp.bfloat16, approx_recip=True)
    jax.block_until_ready((y3, aw3))
    assert jnp.allclose(y3, y_ref, atol=1e-1, rtol=1e-1)
    assert jnp.allclose(aw3, aw_ref, atol=1e-1, rtol=1e-1)

    print("KERNEL_OK")
</pallas_src>

<mosaic_0001>
module attributes {stable_mosaic.version = 11 : i64} {
  func.func @_attention_kernel(%arg0: i32, %arg1: memref<2x8x32xf32, #tpu.memory_space<vmem>>, %arg2: memref<32x96xf32, #tpu.memory_space<vmem>>, %arg3: memref<1x96xf32, #tpu.memory_space<vmem>>, %arg4: memref<32x32xf32, #tpu.memory_space<vmem>>, %arg5: memref<1x32xf32, #tpu.memory_space<vmem>>, %arg6: memref<2x8x32xf32, #tpu.memory_space<vmem>>, %arg7: memref<2x8x8xf32, #tpu.memory_space<vmem>>) attributes {dimension_semantics = [#tpu.dimension_semantics<parallel>], iteration_bounds = array<i64: 2>, scalar_prefetch = 0 : i64, scratch_operands = 0 : i64, tpu.core_type = #tpu.core_type<tc>, window_params = [{transform_indices = @transform_0, window_bounds = array<i64: 2, 8, 32>}, {pipeline_mode = #tpu.pipeline_mode<synchronous>, transform_indices = @transform_1, window_bounds = array<i64: 32, 96>}, {pipeline_mode = #tpu.pipeline_mode<synchronous>, transform_indices = @transform_2, window_bounds = array<i64: 1, 96>}, {pipeline_mode = #tpu.pipeline_mode<synchronous>, transform_indices = @transform_3, window_bounds = array<i64: 32, 32>}, {pipeline_mode = #tpu.pipeline_mode<synchronous>, transform_indices = @transform_4, window_bounds = array<i64: 1, 32>}, {transform_indices = @transform_5, window_bounds = array<i64: 2, 8, 32>}, {transform_indices = @transform_6, window_bounds = array<i64: 2, 8, 8>}]} {
    %c0 = arith.constant 0 : index
    %c0_0 = arith.constant 0 : index
    %c0_1 = arith.constant 0 : index
    %0 = vector.load %arg1[%c0, %c0_0, %c0_1] : memref<2x8x32xf32, #tpu.memory_space<vmem>>, vector<2x8x32xf32>
    %1 = vector.shape_cast %0 : vector<2x8x32xf32> to vector<16x32xf32>
    %c0_2 = arith.constant 0 : index
    %c0_3 = arith.constant 0 : index
    %2 = vector.load %arg2[%c0_2, %c0_3] : memref<32x96xf32, #tpu.memory_space<vmem>>, vector<32x96xf32>
    %cst = arith.constant dense<0.000000e+00> : vector<16x96xf32>
    %3 = tpu.matmul %1, %2, %cst {dimension_numbers = #tpu.dot_dimension_numbers<[1], [0], [0], [1], [0, 0, 1, 1], [], []>} : vector<16x32xf32>, vector<32x96xf32>, vector<16x96xf32> -> vector<16x96xf32>
    %c0_4 = arith.constant 0 : index
    %c0_5 = arith.constant 0 : index
    %4 = vector.load %arg3[%c0_4, %c0_5] : memref<1x96xf32, #tpu.memory_space<vmem>>, vector<1x96xf32>
    %5 = vector.broadcast %4 : vector<1x96xf32> to vector<16x96xf32>
    %6 = arith.addf %3, %5 : vector<16x96xf32>
    %7 = vector.extract_strided_slice %6 {offsets = [0, 0], sizes = [16, 32], strides = [1, 1]} : vector<16x96xf32> to vector<16x32xf32>
    %8 = vector.shape_cast %7 : vector<16x32xf32> to vector<2x8x32xf32>
    %cst_6 = arith.constant 0.176776692 : f32
    %9 = vector.broadcast %cst_6 : f32 to vector<2x8x32xf32>
    %10 = arith.mulf %8, %9 : vector<2x8x32xf32>
    %11 = vector.extract_strided_slice %6 {offsets = [0, 32], sizes = [16, 32], strides = [1, 1]} : vector<16x96xf32> to vector<16x32xf32>
    %12 = vector.shape_cast %11 : vector<16x32xf32> to vector<2x8x32xf32>
    %13 = vector.extract_strided_slice %6 {offsets = [0, 64], sizes = [16, 32], strides = [1, 1]} : vector<16x96xf32> to vector<16x32xf32>
    %14 = vector.shape_cast %13 : vector<16x32xf32> to vector<2x8x32xf32>
    "tpu.trace_start"() <{level = 10 : i32, message = "bmk,bnk->bmn"}> : () -> ()
    %cst_7 = arith.constant dense<0.000000e+00> : vector<2x8x8xf32>
    %15 = tpu.matmul %10, %12, %cst_7 {dimension_numbers = #tpu.dot_dimension_numbers<[2], [2], [1], [1], [0, 0, 0, 1, 1, 1], [0], [0]>} : vector<2x8x32xf32>, vector<2x8x32xf32>, vector<2x8x8xf32> -> vector<2x8x8xf32>
    "tpu.trace_stop"() : () -> ()
    %cst_8 = arith.constant dense<0xFF800000> : vector<2x8xf32>
    %16 = vector.multi_reduction <maximumf>, %15, %cst_8 [2] : vector<2x8x8xf32> to vector<2x8xf32>
    %17 = vector.shape_cast %16 : vector<2x8xf32> to vector<2x8x1xf32>
    %18 = vector.broadcast %17 : vector<2x8x1xf32> to vector<2x8x8xf32>
    %19 = arith.subf %15, %18 : vector<2x8x8xf32>
    %20 = math.exp %19 : vector<2x8x8xf32>
    %cst_9 = arith.constant dense<0.000000e+00> : vector<2x8xf32>
    %21 = vector.multi_reduction <add>, %20, %cst_9 [2] : vector<2x8x8xf32> to vector<2x8xf32>
    %22 = vector.shape_cast %21 : vector<2x8xf32> to vector<2x8x1xf32>
    %23 = tpu.reciprocal %22 : vector<2x8x1xf32> -> vector<2x8x1xf32>
    %24 = vector.broadcast %23 : vector<2x8x1xf32> to vector<2x8x8xf32>
    %25 = arith.mulf %20, %24 : vector<2x8x8xf32>
    "tpu.trace_start"() <{level = 10 : i32, message = "bmn,bnk->bmk"}> : () -> ()
    %cst_10 = arith.constant dense<0.000000e+00> : vector<2x8x32xf32>
    %26 = tpu.matmul %25, %14, %cst_10 {dimension_numbers = #tpu.dot_dimension_numbers<[2], [1], [1], [2], [0, 0, 0, 1, 1, 2], [0], [0]>} : vector<2x8x8xf32>, vector<2x8x32xf32>, vector<2x8x32xf32> -> vector<2x8x32xf32>
    "tpu.trace_stop"() : () -> ()
    %27 = vector.shape_cast %26 : vector<2x8x32xf32> to vector<16x32xf32>
    %c0_11 = arith.constant 0 : index
    %c0_12 = arith.constant 0 : index
    %28 = vector.load %arg4[%c0_11, %c0_12] : memref<32x32xf32, #tpu.memory_space<vmem>>, vector<32x32xf32>
    %cst_13 = arith.constant dense<0.000000e+00> : vector<16x32xf32>
    %29 = tpu.matmul %27, %28, %cst_13 {dimension_numbers = #tpu.dot_dimension_numbers<[1], [0], [0], [1], [0, 0, 1, 1], [], []>} : vector<16x32xf32>, vector<32x32xf32>, vector<16x32xf32> -> vector<16x32xf32>
    %c0_14 = arith.constant 0 : index
    %c0_15 = arith.constant 0 : index
    %30 = vector.load %arg5[%c0_14, %c0_15] : memref<1x32xf32, #tpu.memory_space<vmem>>, vector<1x32xf32>
    %31 = vector.broadcast %30 : vector<1x32xf32> to vector<16x32xf32>
    %32 = arith.addf %29, %31 : vector<16x32xf32>
    %33 = vector.shape_cast %32 : vector<16x32xf32> to vector<2x8x32xf32>
    %c0_16 = arith.constant 0 : index
    %c0_17 = arith.constant 0 : index
    %c0_18 = arith.constant 0 : index
    %34 = vector.load %arg6[%c0_16, %c0_17, %c0_18] : memref<2x8x32xf32, #tpu.memory_space<vmem>>, vector<2x8x32xf32>
    tpu.vector_store %arg6[%c0_16, %c0_17, %c0_18], %33 {strides = array<i32>} : memref<2x8x32xf32, #tpu.memory_space<vmem>>, vector<2x8x32xf32>,
    %c0_19 = arith.constant 0 : index
    %c0_20 = arith.constant 0 : index
    %c0_21 = arith.constant 0 : index
    %35 = vector.load %arg7[%c0_19, %c0_20, %c0_21] : memref<2x8x8xf32, #tpu.memory_space<vmem>>, vector<2x8x8xf32>
    tpu.vector_store %arg7[%c0_19, %c0_20, %c0_21], %25 {strides = array<i32>} : memref<2x8x8xf32, #tpu.memory_space<vmem>>, vector<2x8x8xf32>,
    return
  }
  func.func @transform_0(%arg0: i32) -> (i32, i32, i32) {
    %c0_i32 = arith.constant 0 : i32
    %c0_i32_0 = arith.constant 0 : i32
    %c0_i32_1 = arith.constant 0 : i32
    return %arg0, %c0_i32, %c0_i32_0 : i32, i32, i32
  }
  func.func @transform_1(%arg0: i32) -> (i32, i32) {
    %c0_i32 = arith.constant 0 : i32
    %c0_i32_0 = arith.constant 0 : i32
    %c0_i32_1 = arith.constant 0 : i32
    return %c0_i32, %c0_i32_0 : i32, i32
  }
  func.func @transform_2(%arg0: i32) -> (i32, i32) {
    %c0_i32 = arith.constant 0 : i32
    %c0_i32_0 = arith.constant 0 : i32
    %c0_i32_1 = arith.constant 0 : i32
    return %c0_i32, %c0_i32_0 : i32, i32
  }
  func.func @transform_3(%arg0: i32) -> (i32, i32) {
    %c0_i32 = arith.constant 0 : i32
    %c0_i32_0 = arith.constant 0 : i32
    %c0_i32_1 = arith.constant 0 : i32
    return %c0_i32, %c0_i32_0 : i32, i32
  }
  func.func @transform_4(%arg0: i32) -> (i32, i32) {
    %c0_i32 = arith.constant 0 : i32
    %c0_i32_0 = arith.constant 0 : i32
    %c0_i32_1 = arith.constant 0 : i32
    return %c0_i32, %c0_i32_0 : i32, i32
  }
  func.func @transform_5(%arg0: i32) -> (i32, i32, i32) {
    %c0_i32 = arith.constant 0 : i32
    %c0_i32_0 = arith.constant 0 : i32
    %c0_i32_1 = arith.constant 0 : i32
    return %arg0, %c0_i32, %c0_i32_0 : i32, i32, i32
  }
  func.func @transform_6(%arg0: i32) -> (i32, i32, i32) {
    %c0_i32 = arith.constant 0 : i32
    %c0_i32_0 = arith.constant 0 : i32
    %c0_i32_1 = arith.constant 0 : i32
    return %arg0, %c0_i32, %c0_i32_0 : i32, i32, i32
  }
}

</mosaic_0001>

<bundles_post_ra>
// kernel: tpu_custom_call.1
= control target key start
LH: loop header
LB: loop body
LE: loop exit
PB: predicated region body
PF: predicated region fallthrough
CT: control target
= control target key end

     0   :  { %12 = vsyncpa [#allocation3], 0  ;;  %s1762_s0 = inlined_call_operand.hbm [shape: f32[4,8,32], index: 0, kind: input, shape index: {}]   ;;  %s1763_s1 = inlined_call_operand.hbm [shape: f32[32,96], index: 1, kind: input, shape index: {}]   ;;  %s1764_s2 = inlined_call_operand.vmem [shape: f32[1,96], index: 2, kind: input, shape index: {}]   ;;  %s1765_s3 = inlined_call_operand.hbm [shape: f32[32,32], index: 3, kind: input, shape index: {}]   ;;  %s1766_s4 = inlined_call_operand.vmem [shape: f32[1,32], index: 4, kind: input, shape index: {}]   ;;  %s1767_s5 = inlined_call_operand.hbm [shape: f32[4,8,32], index: 5, kind: output, shape index: {0}]   ;;  %s1768_s6 = inlined_call_operand.hbm [shape: f32[4,8,8], index: 6, kind: output, shape index: {1}]  }
   0x1   :  { %14 = vsyncpa [#allocation3 + $0x1], 0 }
   0x2   :  { %15 = vsyncpa [#allocation6], 0 }
   0x3   :  { %16 = vsyncpa [#allocation4], 0 }
   0x4   :  { %18 = vsyncpa [#allocation4 + $0x1], 0 }
   0x5   :  { %19 = vsyncpa [#allocation10], 0 }
   0x6   :  { %21 = vsyncpa [#allocation10 + $0x1], 0  ;;  %s1437_s21 = smov 0   ;;  %s1439_s22 = smov 0  }
   0x7   :  { %s1441_s23 = smov 0   ;;  %s1443_s24 = smov 0  }
   0x8 LB: > { %s1458_s25 = sadd.s32 4294967295, %s1387_s24   ;;  %s996_s26 = sadd.s32 4294967294, %s1387_s24   ;;  %s1387_s24 = sphi %s1443_s24, %s1788_s24   ;;  %s1383_s23 = sphi %s1441_s23, %s1787_s23   ;;  %s1379_s22 = sphi %s1439_s22, %s1786_s22   ;;  %s1375_s21 = sphi %s1437_s21, %s1785_s21  }
   0x9   : > { %p47_p0 = scmp.ne.s32.totalorder %s1379_s22, %s1375_s21  ;;  %p1769_p1 = scmp.eq.s32.totalorder %s1458_s25, 0 }
   0xa   : > { %p161_p3 = scmp.eq.s32.totalorder %s996_s26, 1  ;;  %p997_p5 = scmp.ge.s32.totalorder %s1387_s24, 1 }
   0xb   : > { %p1467_p4 = por %p1769_p1, %p47_p0  ;;  %p194_p7 = scmp.lt.s32.totalorder %s1387_s24, 3 }
   0xc   : > { %p1472_p6 = por %p161_p3, %p47_p0  ;;  %s1389_s30 = smov [#allocation5]  }
   0xd   : > { %s1772_s27 = scalar_select %p1467_p4, 1, 0 }
   0xe   : > { %s1773_s28 = scalar_select %p1472_p6, 1, 0 }
   0xf   : > { %p1477_p8 = pnand %p997_p5, %p194_p7  ;;  %s206_s7 = sshll.u32 %s1389_s30, 4  ;;  %s1481_s7 = int_to_ptr.vmem [resolvable:$true] %s206_s7 }
  0x10   : > { %s1390_s9 = smov [#allocation7]   ;;  %s1199_s13 = scalar_lea.hbm %s1763_s1, 512 }
  0x11   : > { %p1125_p9 = pneg %p1477_p8  ;;  %s222_s10 = sshll.u32 %s1390_s9, 4  ;;  %s1492_s10 = int_to_ptr.vmem [resolvable:$true] %s222_s10 }
  0x12   : > { %p1200_p12 = scmp.ne.s32.totalorder %s1763_s1, %s1199_s13  ;;  %p1206_p5 = scmp.lt.u32.totalorder %s1199_s13, %s1763_s1 }
  0x13   : > { %p1488_p11 = pnand %p1125_p9, %p1769_p1 }
  0x15   : > { %p1201_p13 = pneg %p1488_p11 }
  0x17   : > { %p1202_p0 = pnand %p1201_p13, %p1200_p12 }
  0x19   : > { %p1203_p3 = pneg %p1202_p0 }
  0x1b   : > { %p1208_p7 = pnand %p1206_p5, %p1203_p3 }
  0x1d   : > { %1211 = shalt.err (!%p1208_p7)
}
  0x1e   : > { %s1212_s18 = scalar_lea.vmem %s1481_s7, 512  ;;  %p1220_p2 = scmp.lt.s32.totalorder %s1481_s7, %s1481_s7 }
  0x1f   : > { %p1213_p9 = scmp.ne.s32.totalorder %s1481_s7, %s1212_s18  ;;  %p1221_p12 = scmp.lt.s32.totalorder %s1212_s18, %s1212_s18 }
  0x21   : > { %p1215_p10 = pnand %p1213_p9, %p1201_p13  ;;  %p1222_p0 = por %p1221_p12, %p1220_p2 }
  0x23   : > { %p1216_p1 = pneg %p1215_p10 }
  0x25   : > { %p1223_p6 = pnand %p1222_p0, %p1216_p1 }
  0x27   : > { %1226 = shalt.err (!%p1223_p6)
}
  0x28   : > { %s1391_s19 = smov 128   ;;  %s1392_s20 = smov 8  }
  0x29   : > { %1128 = dma.hbm_to_vmem [thread:$0]  (!%p1488_p11), %s1763_s1, 512, %s1481_s7, [#allocation6], %s1391_s19, %s1391_s19, %s1392_s20  }
  0x2a   : > { %s1227_s12 = scalar_lea.hbm %s1765_s3, 512 }
  0x2b   : > { %p1228_p1 = scmp.ne.s32.totalorder %s1765_s3, %s1227_s12  ;;  %p1234_p10 = scmp.lt.u32.totalorder %s1227_s12, %s1765_s3 }
  0x2d   : > { %p1230_p2 = pnand %p1228_p1, %p1201_p13 }
  0x2f   : > { %p1231_p6 = pneg %p1230_p2 }
  0x31   : > { %p1236_p3 = pnand %p1234_p10, %p1231_p6 }
  0x33   : > { %1239 = shalt.err (!%p1236_p3)
}
  0x34   : > { %s1240_s7 = scalar_lea.vmem %s1492_s10, 512  ;;  %p1248_p12 = scmp.lt.s32.totalorder %s1492_s10, %s1492_s10 }
  0x35   : > { %p1241_p5 = scmp.ne.s32.totalorder %s1492_s10, %s1240_s7  ;;  %p1249_p0 = scmp.lt.s32.totalorder %s1240_s7, %s1240_s7 }
  0x37   : > { %p1243_p7 = pnand %p1241_p5, %p1201_p13  ;;  %p1250_p1 = por %p1249_p0, %p1248_p12 }
  0x39   : > { %p1244_p9 = pneg %p1243_p7 }
  0x3b   : > { %p1251_p2 = pnand %p1250_p1, %p1244_p9 }
  0x3d   : > { %1254 = shalt.err (!%p1251_p2)
}
  0x3e   : > { %1131 = dma.hbm_to_vmem [thread:$0]  (!%p1488_p11), %s1765_s3, 512, %s1492_s10, [#allocation6], %s1391_s19, %s1391_s19, %s1392_s20  }
  0x3f   : > { %s1553_s8 = sadd.s32 1, %s1387_s24   ;;  %s34_s26 = sadd.s32 1, %s1383_s23 }
  0x40   : > { %s31_s30 = ssub.s32 %s1387_s24, %s1553_s8  ;;  %p41_p13 = scmp.ne.s32.totalorder %s1383_s23, %s1379_s22 }
  0x41   : > { %p32_p6 = scmp.eq.s32.totalorder %s31_s30, 0  ;;  %p42_p10 = scmp.eq.s32.totalorder %s1387_s24, 0 }
  0x42   : > { %p1776_p3 = scmp.eq.s32.totalorder %s1458_s25, 1  ;;  %p1145_p7 = scmp.lt.s32.totalorder %s1387_s24, 2 }
  0x43   : > { %s1569_s11 = scalar_select %p32_p6, %s1383_s23, %s34_s26  }
  0x44   : > { %p1563_p5 = por %p1776_p3, %p41_p13  ;;  %p43_p9 = por %p42_p10, %p41_p13 }
  0x45   : > { %s239_s12 = sand.u32 1, %s1383_s23   ;;  %s1030_s10 = sshll.u32 %s1387_s24, 8 }
  0x46   : > { %s1777_s9 = scalar_select %p1563_p5, 1, 0 }
  0x47   : > { %s1001_s13 = sshll.u32 %s239_s12, 4  ;;  %s1576_s16 = scalar_lea.hbm %s1762_s0, %s1030_s10 }
  0x48   : > { %s243_s7 = scalar_lea.vmem [#allocation2], %s1001_s13  ;;  %p1580_p11 = pnand %p1145_p7, %p43_p9 }
  0x49   : > { %s250_s17 = sshll.u32 %s243_s7, 4  ;;  %s1584_s26 = scalar_lea.sflag [#allocation3], %s239_s12  ;;  %s1578_s17 = int_to_ptr.vmem [resolvable:$true] %s250_s17 }
  0x4a   : > { %s1255_s30 = scalar_lea.hbm %s1576_s16, 256  ;;  %p1257_p0 = pneg %p1580_p11 }
  0x4b   : > { %p1256_p12 = scmp.ne.s32.totalorder %s1576_s16, %s1255_s30  ;;  %s1260_s14 = scalar_lea.hbm %s1762_s0, 512 }
  0x4c   : > { %p1261_p13 = scmp.lt.u32.totalorder %s1576_s16, %s1762_s0  ;;  %p1262_p6 = scmp.lt.u32.totalorder %s1260_s14, %s1255_s30 }
  0x4d   : > { %p1258_p1 = pnand %p1257_p0, %p1256_p12  ;;  %p1264_p3 = scmp.lt.u32.totalorder %s1255_s30, %s1576_s16 }
  0x4e   : > { %p1263_p10 = por %p1262_p6, %p1261_p13 }
  0x4f   : > { %p1259_p2 = pneg %p1258_p1 }
  0x50   : > { %p1265_p7 = por %p1264_p3, %p1263_p10 }
  0x52   : > { %p1266_p9 = pnand %p1265_p7, %p1259_p2 }
  0x54   : > { %1269 = shalt.err (!%p1266_p9)
}
  0x55   : > { %s1270_s12 = scalar_lea.vmem %s1578_s17, 256  ;;  %s1393_s13 = smov [#allocation2]  }
  0x56   : > { %p1271_p12 = scmp.ne.s32.totalorder %s1578_s17, %s1270_s12  ;;  %s1275_s10 = sshll.u32 %s1393_s13, 4  ;;  %s1276_s10 = int_to_ptr.vmem [resolvable:$false] %s1275_s10 }
  0x57   : > { %s1277_s15 = scalar_lea.vmem %s1276_s10, 512  ;;  %p1278_p4 = scmp.lt.s32.totalorder %s1578_s17, %s1276_s10 }
  0x58   : > { %p1273_p1 = pnand %p1271_p12, %p1257_p0  ;;  %p1279_p13 = scmp.lt.s32.totalorder %s1277_s15, %s1270_s12 }
  0x5a   : > { %p1274_p5 = pneg %p1273_p1  ;;  %p1280_p6 = por %p1279_p13, %p1278_p4 }
  0x5c   : > { %p1281_p10 = pnand %p1280_p6, %p1274_p5 }
  0x5e   : > { %1284 = shalt.err (!%p1281_p10)
}
  0x5f   : > { %1135 = dma.hbm_to_vmem [thread:$0]  (!%p1580_p11), %s1576_s16, 256, %s1578_s17, %s1584_s26, %s1391_s19, %s1391_s19, %s1392_s20  }
  0x60   : > { %262 = sbr.rel (%p1477_p8) target bundleno = 1422 (0x58e), region = 40  ;;  %s1618_s30 = sand.u32 (!%p1477_p8), 1, %s1379_s22  }
  0x61   : > { %s1621_s14 = sshll.u32 (!%p1477_p8), %s1618_s30, 4  ;;  %s265_s18 = scalar_lea.sflag (!%p1477_p8), [#allocation3], %s1618_s30 }
  0x62   : > { %s268_s7 = scalar_lea.vmem (!%p1477_p8), [#allocation2], %s1621_s14  ;;  %p1779_p4 = scmp.ne.s32.totalorder (!%p1477_p8), %s1772_s27, 0 }
  0x67   : > { %1358 = dma.done.wait (%p1779_p4), %s265_s18, 256  }
  0x68   : > { %1360 = vsyncadd (%p1779_p4), %s265_s18, 4294967040  ;;  %p1780_p5 = scmp.eq.s32.totalorder %s1458_s25, 0 }
  0x6a   : > { %1362 = dma.done.wait (%p1780_p5), [#allocation6], 1024   ;;  %p1781_p8 = pmov %p1780_p5 }
  0x6b   : > { %vm326_vm0 = vcmask 261120   ;;  %v315_v0 = vld [vmem:[#allocation5] sm:$0xff]  ;;  %v316_v1 = vld [vmem:[#allocation5 + $0x8] sm:$0xff]  ;;  %v317_v2 = vld [vmem:[#allocation5 + $0x10] sm:$0xff]  ;;  %v1394_v8 = vmov 0.0   ;;  %vm1395_vm1 = vmmov 0  }
  0x6c   : > { %1364 = vsyncadd (%p1781_p8), [#allocation6], 4294966272  ;;  %v1095_v3 = vpack.c.bf16 %v316_v1, %v315_v0  ;;  %v318_v4 = vld [vmem:[#allocation5 + $0x18] sm:$0xff]  ;;  %v313_v5 = vld [vmem:[%s268_s7] sm:$0xff]  ;;  %1064 = vmatprep.subr.mxu1 %v1394_v8  ;;  %1066 = vmatprep.mubr.msk.f32.mxu1 %vm1395_vm1, %v1394_v8  ;;  %s1396_s19 = smov 96   ;;  %vm566_vm2 = vcmask 64512  }
  0x6d   : > { %v1099_v6 = vpack.c.bf16 %v318_v4, %v317_v2  ;;  %1061 = vmatprep.mubr.msk.f32.mxu0 %vm326_vm0, %v313_v5  ;;  %v314_v7 = vld [vmem:[%s268_s7 + $0x8] sm:$0xff]  ;;  %v1010_v9 = vld [vmem:[%s1764_s2] ss:$0 sm:$0xff]  ;;  %s1397_s20 = smov 64   ;;  %s309_s16 = scalar_lea.vmem [#allocation9], %s1621_s14  ;;  %v743_v45 = vld [vmem:[#allocation7 + $0x10] sm:$0xff] }
  0x6e   : > { %1096 = vmatprep.subr.bf16.mxu0 %v1095_v3  ;;  %v741_v35 = vld [vmem:[#allocation7] sm:$0xff]  ;;  %v742_v36 = vld [vmem:[#allocation7 + $0x8] sm:$0xff]  ;;  %v744_v46 = vld [vmem:[#allocation7 + $0x18] sm:$0xff]  ;;  %s1031_s17 = sshll.u32 %s1458_s25, 8  ;;  %s872_s10 = sshll.u32 %s309_s16, 4  ;;  %s1673_s10 = int_to_ptr.vmem [resolvable:$true] %s872_s10 }
  0x6f   : > { %1098 = vmatpush3.bf16.msra.mxu0 %v1095_v3  ;;  %v1103_v37 = vpack.c.bf16 %v742_v36, %v741_v35  ;;  %v1107_v47 = vpack.c.bf16 %v744_v46, %v743_v45  ;;  %s1671_s13 = scalar_lea.hbm %s1768_s6, %s1031_s17  ;;  %s843_s15 = scalar_lea.sflag [#allocation10], %s1618_s30 }
  0x70   : > { %1100 = vmatprep.subr.bf16.mxu0 %v1099_v6  ;;  %s1285_s18 = scalar_lea.vmem %s1673_s10, 256  ;;  %p1782_p0 = scmp.ne.s32.totalorder %s1777_s9, 0 }
  0x71   : > { %p1286_p11 = scmp.ne.s32.totalorder %s1673_s10, %s1285_s18  ;;  %s1398_s7 = smov [#allocation9]  }
  0x72   : > { %s1289_s27 = sshll.u32 %s1398_s7, 4  ;;  %s1290_s27 = int_to_ptr.vmem [resolvable:$false] %s1289_s27 }
  0x73   : > { %1102 = vmatpush3.bf16.msra.mxu0 %v1099_v6  ;;  %p1287_p2 = pnand %p1286_p11, %p1782_p0  ;;  %s1291_s29 = scalar_lea.vmem %s1290_s27, 512 }
  0x74   : > { %1104 = vmatprep.subr.bf16.mxu0 %v1103_v37  ;;  %p1292_p7 = scmp.lt.s32.totalorder %s1673_s10, %s1290_s27  ;;  %p1293_p9 = scmp.lt.s32.totalorder %s1291_s29, %s1285_s18 }
  0x75   : > { %p1288_p3 = pneg %p1287_p2 }
  0x76   : > { %1062 = vmatmul.mubr.msk.f32.vlgmr.msra.gmra.mrb[0].mxu0 %vm326_vm0, %v314_v7  ;;  %p1294_p12 = por %p1293_p9, %p1292_p7 }
  0x77   : > { %1106 = vmatpush3.bf16.msra.mxu0 %v1103_v37 }
  0x78   : > { %1108 = vmatprep.subr.bf16.mxu0 %v1107_v47  ;;  %p1295_p1 = pnand %p1294_p12, %p1288_p3 }
  0x7b   : > { %1110 = vmatpush3.bf16.msra.mxu0 %v1107_v47 }
 0x149   : > { %v1063_v10 = vpop.f32.mrb[0].mxu0 }
 0x14a   : > { %v399_v11 = vpop.f32.mrb[1].mxu0  ;;  %v405_v13 = vadd.f32 %v1063_v10, %v1010_v9 }
 0x14b   : > { %v400_v12 = vadd.f32 %v1010_v9, %v399_v11 }
 0x14c   : > { %v409_v17 = vmul.f32 0.17677669, %v405_v13 }
 0x14d   : > { %411 = vrot.lane.b32.xlu0 %v400_v12, %s1396_s19  ;;  %v408_v15 = vmul.f32 0.17677669, %v400_v12 }
 0x151   : > { %489 = vrot.lane.b32.xlu0 %v405_v13, %s1396_s19 }
 0x1bf   : > { %v412_v14 = vpop.permute.xlu0 %411 }
 0x1c0   : > { %1065 = vmatpush3.xpose.msk.msra.mxu1 %vm326_vm0, %v412_v14 }
 0x1c1   : > { %1069 = vmatprep.subr.mxu1 %v1394_v8 }
 0x1c3   : > { %v490_v16 = vpop.permute.xlu0 %489  ;;  %1067 = vmatmul.mubr.msk.f32.vlgmr.msra.gmra.mrb[0].mxu1 %vm326_vm0, %v408_v15 }
 0x1c4   : > { %1070 = vmatpush3.xpose.msk.msra.mxu1 %vm326_vm0, %v490_v16  ;;  %1071 = vmatprep.mubr.msk.f32.mxu1 %vm1395_vm1, %v1394_v8 }
 0x1c5   : > { %1074 = vmatprep.subr.mxu1 %v1394_v8 }
 0x1c7   : > { %1072 = vmatmul.mubr.msk.f32.vlgmr.msra.gmra.mrb[2].mxu1 %vm326_vm0, %v409_v17 }
 0x1c8   : > { %1076 = vmatprep.mubr.msk.f32.mxu1 %vm1395_vm1, %v1394_v8 }
 0x296   : > { %v484_v18 = vpop.f32.mrb[0].mxu1 }
 0x297   : > { %v1068_v19 = vpop.f32.mrb[1].mxu1  ;;  %v567_v20 = vsel %vm566_vm2, %v484_v18, -inf }
 0x298   : > { %568 = vmax.xlane.f32.xlu1 %v567_v20 }
 0x29a   : > { %v562_v21 = vpop.f32.mrb[2].mxu1 }
 0x29b   : > { %v1073_v22 = vpop.f32.mrb[3].mxu1  ;;  %v570_v23 = vsel %vm566_vm2, %v562_v21, -inf }
 0x29c   : > { %571 = vmax.xlane.f32.xlu1 %v570_v23 }
 0x2ad   : > { %589 = vrot.lane.b32.xlu1 %v400_v12, %s1397_s20 }
 0x325   : > { %v569_v24 = vpop.xlane.xlu1 %568 }
 0x326   : > { %v573_v25 = vsub.f32 %v484_v18, %v569_v24 }
 0x328   : > { %v575_v26 = vmul.f32 1.442695, %v573_v25 }
 0x329   : > { %v572_v27 = vpop.xlane.xlu1 %571 }
 0x32a   : > { %1191 = vpow2.f32 %v575_v26  ;;  %v574_v28 = vsub.f32 %v562_v21, %v572_v27 }
 0x32c   : > { %v577_v29 = vmul.f32 1.442695, %v574_v28 }
 0x32d   : > { %v590_v30 = vpop.permute.xlu1 %589 }
 0x32e   : > { %1193 = vpow2.f32 %v577_v29  ;;  %1075 = vmatpush3.msra.mxu1 %v590_v30 }
 0x32f   : > { %1079 = vmatprep.subr.mxu1 %v1394_v8 }
 0x334   : > { %v1192_v31 = vpop.eup %1191 }
 0x335   : > { %v579_v32 = vsel %vm566_vm2, %v1192_v31, 0.0 }
 0x336   : > { %580 = vadd.xlane.f32.xlu0 %v579_v32 }
 0x338   : > { %v1194_v33 = vpop.eup %1193 }
 0x339   : > { %v582_v34 = vsel %vm566_vm2, %v1194_v33, 0.0 }
 0x33a   : > { %583 = vadd.xlane.f32.xlu1 %v582_v34 }
 0x34b   : > { %665 = vrot.lane.b32.xlu1 %v405_v13, %s1397_s20 }
 0x3c3   : > { %v581_v38 = vpop.xlane.xlu0 %580 }
 0x3c4   : > { %1195 = vrcp.f32 %v581_v38 }
 0x3c7   : > { %v584_v39 = vpop.xlane.xlu1 %583 }
 0x3c8   : > { %1197 = vrcp.f32 %v584_v39 }
 0x3cb   : > { %v666_v42 = vpop.permute.xlu1 %665 }
 0x3ce   : > { %v1196_v40 = vpop.eup %1195 }
 0x3cf   : > { %v587_v41 = vmul.f32 %v1196_v40, %v1192_v31 }
 0x3d1   : > { %1077 = vmatmul.mubr.msk.f32.vlgmr.msra.gmra.mrb[4].mxu1 %vm566_vm2, %v587_v41  ;;  %835 = vst.msk [vmem:[%s309_s16] sm:$0xff] %vm566_vm2, %v587_v41 }
 0x3d2   : > { %v1198_v43 = vpop.eup %1197  ;;  %1080 = vmatpush3.msra.mxu1 %v666_v42  ;;  %1081 = vmatprep.mubr.msk.f32.mxu1 %vm1395_vm1, %v1394_v8 }
 0x3d3   : > { %v588_v44 = vmul.f32 %v1198_v43, %v1194_v33 }
 0x3d5   : > { %1082 = vmatmul.mubr.msk.f32.vlgmr.msra.gmra.mrb[6].mxu1 %vm566_vm2, %v588_v44  ;;  %836 = vst.msk [vmem:[%s309_s16 + $0x8] sm:$0xff] %vm566_vm2, %v588_v44 }
 0x4a4   : > { %v661_v48 = vpop.f32.mrb[4].mxu1 }
 0x4a5   : > { %v1078_v49 = vpop.f32.mrb[5].mxu1  ;;  %1092 = vmatprep.mubr.msk.f32.mxu0 %vm326_vm0, %v661_v48 }
 0x4a8   : > { %v737_v50 = vpop.f32.mrb[6].mxu1 }
 0x4a9   : > { %v1083_v51 = vpop.f32.mrb[7].mxu1  ;;  %1093 = vmatmul.mubr.msk.f32.vlgmr.msra.gmra.mrb[2].mxu0 %vm326_vm0, %v737_v50 }
 0x4aa   : > { %1298 = shalt.err (!%p1295_p1)
}
 0x4ab   : > { %s1299_s19 = scalar_lea.hbm %s1671_s13, 256  ;;  %s1303_s26 = scalar_lea.hbm %s1768_s6, 512 }
 0x4ac   : > { %p1300_p13 = scmp.ne.s32.totalorder %s1671_s13, %s1299_s19  ;;  %p1304_p4 = scmp.lt.u32.totalorder %s1671_s13, %s1768_s6 }
 0x4ad   : > { %p1305_p5 = scmp.lt.u32.totalorder %s1303_s26, %s1299_s19  ;;  %p1307_p11 = scmp.lt.u32.totalorder %s1299_s19, %s1671_s13 }
 0x4ae   : > { %p1301_p6 = pnand %p1300_p13, %p1782_p0 }
 0x4af   : > { %p1306_p8 = por %p1305_p5, %p1304_p4 }
 0x4b0   : > { %p1302_p10 = pneg %p1301_p6 }
 0x4b1   : > { %p1308_p2 = por %p1307_p11, %p1306_p8 }
 0x4b3   : > { %p1309_p3 = pnand %p1308_p2, %p1302_p10 }
 0x4b5   : > { %1312 = shalt.err (!%p1309_p3)
}
 0x4b6   : > { %s1399_s18 = smov 128   ;;  %s1400_s27 = smov 8   ;;  %v1019_v52 = vld [vmem:[%s1766_s4] ss:$0 sm:$0xff] }
 0x4b7   : > { %1122 = dma.vmem_to_hbm [thread:$0]  (%p1782_p0), %s1673_s10, 256, %s1671_s13, %s843_s15, %s1399_s18, %s1399_s18, %s1400_s27  }
 0x4b8   : > { %s302_s20 = scalar_lea.vmem [#allocation8], %s1621_s14  ;;  %s1713_s13 = scalar_lea.hbm %s1767_s5, %s1031_s17 }
 0x4b9   : > { %s856_s16 = sshll.u32 %s302_s20, 4  ;;  %s838_s14 = scalar_lea.sflag [#allocation4], %s1618_s30  ;;  %s1706_s16 = int_to_ptr.vmem [resolvable:$true] %s856_s16 }
 0x4ba   : > { %s1313_s10 = scalar_lea.vmem %s1706_s16, 256  ;;  %s1401_s15 = smov [#allocation8]  }
 0x4bb   : > { %p1314_p7 = scmp.ne.s32.totalorder %s1706_s16, %s1313_s10  ;;  %s1317_s7 = sshll.u32 %s1401_s15, 4  ;;  %s1318_s7 = int_to_ptr.vmem [resolvable:$false] %s1317_s7 }
 0x4bc   : > { %s1319_s29 = scalar_lea.vmem %s1318_s7, 512  ;;  %p1320_p1 = scmp.lt.s32.totalorder %s1706_s16, %s1318_s7 }
 0x4bd   : > { %p1315_p9 = pnand %p1314_p7, %p1782_p0  ;;  %p1321_p13 = scmp.lt.s32.totalorder %s1319_s29, %s1313_s10 }
 0x4bf   : > { %p1316_p12 = pneg %p1315_p9  ;;  %p1322_p6 = por %p1321_p13, %p1320_p1 }
 0x4c1   : > { %p1323_p10 = pnand %p1322_p6, %p1316_p12 }
 0x57c   : > { %v1094_v53 = vpop.f32.mrb[2].mxu0 }
 0x57d   : > { %v830_v54 = vadd.f32 %v1094_v53, %v1019_v52  ;;  %v824_v55 = vpop.f32.mrb[3].mxu0 }
 0x57e   : > { %v825_v56 = vadd.f32 %v1019_v52, %v824_v55 }
 0x57f   : > { %834 = vst.msk [vmem:[%s302_s20 + $0x8] sm:$0xff] %vm326_vm0, %v830_v54 }
 0x580   : > { %833 = vst.msk [vmem:[%s302_s20] sm:$0xff] %vm326_vm0, %v825_v56 }
 0x581   : > { %1326 = shalt.err (!%p1323_p10)
}
 0x582   : > { %s1327_s25 = scalar_lea.hbm %s1713_s13, 256  ;;  %s1331_s20 = scalar_lea.hbm %s1767_s5, 512 }
 0x583   : > { %p1328_p4 = scmp.ne.s32.totalorder %s1713_s13, %s1327_s25  ;;  %p1332_p11 = scmp.lt.u32.totalorder %s1713_s13, %s1767_s5 }
 0x584   : > { %p1333_p2 = scmp.lt.u32.totalorder %s1331_s20, %s1327_s25  ;;  %p1335_p7 = scmp.lt.u32.totalorder %s1327_s25, %s1713_s13 }
 0x585   : > { %p1329_p5 = pnand %p1328_p4, %p1782_p0 }
 0x586   : > { %p1334_p3 = por %p1333_p2, %p1332_p11 }
 0x587   : > { %p1330_p8 = pneg %p1329_p5 }
 0x588   : > { %p1336_p9 = por %p1335_p7, %p1334_p3 }
 0x58a   : > { %p1337_p12 = pnand %p1336_p9, %p1330_p8 }
 0x58c   : > { %1340 = shalt.err (!%p1337_p12)
}
 0x58d   : > { %1121 = dma.vmem_to_hbm [thread:$0]  (%p1782_p0), %s1706_s16, 256, %s1713_s13, %s838_s14, %s1399_s18, %s1399_s18, %s1400_s27  }
 0x58e PF: > { %s887_s10 = sand.u32 1, %s1375_s21   ;;  %p1783_p1 = scmp.ne.s32.totalorder %s1773_s28, 0 }
 0x58f   : > { %p1784_p13 = scmp.ge.s32.totalorder %s1387_s24, 2  ;;  %s888_s15 = scalar_lea.sflag [#allocation4], %s887_s10 }
 0x591   : > { %p1137_p6 = pnand %p1784_p13, %p1783_p1 }
 0x593   : > { %1366 = dma.done.wait (!%p1137_p6), %s888_s15, 256  }
 0x594   : > { %1368 = vsyncadd (!%p1137_p6), %s888_s15, 4294967040  ;;  %s897_s9 = scalar_lea.sflag [#allocation10], %s887_s10 }
 0x595   : > { %1370 = dma.done.wait (!%p1137_p6), %s897_s9, 256  }
 0x596   : > { %1372 = vsyncadd (!%p1137_p6), %s897_s9, 4294967040  ;;  %p24_p0 = scmp.ge.s32.totalorder %s1553_s8, 4   ;;  %s1785_s21 = smov %s1379_s22 }
 0x597   : > { %s1786_s22 = smov %s1383_s23  ;;  %s1787_s23 = smov %s1569_s11 }
 0x598   : > { %s1788_s24 = smov %s1553_s8  ;;  %26 = sbr.rel (!%p24_p0) target bundleno = 8 (0x8), region = 110 }
 0x59f   :  { %902 = vsyncpa [#allocation3], 1 }
 0x5a0   :  { %904 = vsyncpa [#allocation3 + $0x1], 1 }
 0x5a1   :  { %905 = vsyncpa [#allocation6], 1 }
 0x5a2   :  { %906 = vsyncpa [#allocation4], 1 }
 0x5a3   :  { %908 = vsyncpa [#allocation4 + $0x1], 1 }
 0x5a4   :  { %909 = vsyncpa [#allocation10], 1 }
 0x5a5   :  { %911 = vsyncpa [#allocation10 + $0x1], 1 }

</bundles_post_ra>
